<compile_context>
chip_gen: v7x
topology: tpu7x:2x2x1
jax: 0.10.0
libtpu: 0.0.40
codegen_flags: <defaults>
</compile_context>

<pallas_src>
import numpy as np
import jax
import jax.numpy as jnp
from jax import lax
from jax.experimental import pallas as pl
from jax.experimental.pallas import tpu as pltpu


# ------------------------------------------------------------- interp glue ---
def _interp_matrix(n_out, n_in):
    """Bilinear (align_corners=True) 1-D interpolation matrix; rows sum to 1."""
    A = np.zeros((n_out, n_in), np.float32)
    if n_in == 1:
        A[:, 0] = 1.0
        return A
    if n_out == 1:
        A[0, 0] = 1.0
        return A
    scale = (n_in - 1) / (n_out - 1)
    for i in range(n_out):
        pos = i * scale
        i0 = min(int(np.floor(pos)), n_in - 1)
        frac = pos - i0
        i1 = min(i0 + 1, n_in - 1)
        A[i, i0] += 1.0 - frac
        A[i, i1] += frac
    return A


def _padded_up_mats(Hout, Wout, Hs, Ws):
    """Separable upsample matrices with the conv_final zero padding folded in.

    Ah_pad : (Hout+3, Hs)  rows 0, Hout+1, Hout+2 are zero (top pad 1, bottom pad 2;
             the extra bottom row keeps the flattened im2col tap slices in bounds).
    AwT_pad: (Ws, Wout+2)  cols 0, Wout+1 are zero (left/right pad 1).
    Interior interpolation weights sum to 1, so upsample(feature + bias) is exact
    and the zero border stays exactly zero.
    """
    Hp, Wp = Hout + 3, Wout + 2
    ah = np.zeros((Hp, Hs), np.float32)
    ah[1:Hout + 1] = _interp_matrix(Hout, Hs)
    awt = np.zeros((Ws, Wp), np.float32)
    awt[:, 1:Wout + 1] = _interp_matrix(Wout, Ws).T
    return jnp.asarray(ah, jnp.bfloat16), jnp.asarray(awt, jnp.bfloat16)


def _maxpool(x_nchw, k):
    # TODO(synk): MaxPool2d stays as XLA reduce_window glue (cheap, memory-bound);
    # not worth a dedicated Pallas kernel at these sizes.
    if k == 1:
        return x_nchw
    return lax.reduce_window(x_nchw, -jnp.inf, lax.max,
                             (1, 1, k, k), (1, 1, k, k), "VALID")


# ------------------------------------------------------------------ kernels --
def _upsample_pad_kernel(x_ref, ah_ref, awt_ref, o_ref):
    # x_ref: (C, Hs, Ws) f32; ah_ref: (Hp, Hs) bf16; awt_ref: (Ws, Wp) bf16
    # o_ref: (C, Hp, Wp) f32  -- separable bilinear upsample with zero conv border.
    C = x_ref.shape[0]
    ah = ah_ref[...]
    awt = awt_ref[...]
    for c in range(C):                              # C is tiny: static unroll
        u = jnp.dot(ah, x_ref[c].astype(jnp.bfloat16),
                    preferred_element_type=jnp.float32)            # (Hp, Ws)
        o_ref[c] = jnp.dot(u.astype(jnp.bfloat16), awt,
                           preferred_element_type=jnp.float32)     # (Hp, Wp)


def _conv1x1_upsample_pad_kernel(x_ref, ah_ref, awt_ref, wt_ref, b_ref, o_ref):
    # 1x1 conv over channels (+bias, f32) at pooled resolution, then separable
    # bilinear upsample with the zero conv border folded into ah/awt.
    # x_ref: (Cin, Hs, Ws) f32; wt_ref: SMEM (Cout, Cin) f32; b_ref: SMEM (Cout,) f32
    Cout, Cin = wt_ref.shape
    ah = ah_ref[...]
    awt = awt_ref[...]
    xs = [x_ref[ci] for ci in range(Cin)]           # (Hs, Ws) f32 each
    # TODO(synk): for large Cin/Cout do the 1x1 conv as one (Cout,Cin)@(Cin,Hs*Ws)
    # MXU matmul instead of Cin scalar multiply-adds per output channel.
    for co in range(Cout):
        acc = wt_ref[co, 0] * xs[0]
        for ci in range(1, Cin):
            acc = acc + wt_ref[co, ci] * xs[ci]
        acc = acc + b_ref[co]                       # bias in f32, before upsample
        u = jnp.dot(ah, acc.astype(jnp.bfloat16),
                    preferred_element_type=jnp.float32)            # (Hp, Ws)
        o_ref[co] = jnp.dot(u.astype(jnp.bfloat16), awt,
                            preferred_element_type=jnp.float32)    # (Hp, Wp)


# ----------------------------------------------------------------- wrappers --
def upsample_pad(x, ah_pad, awt_pad):
    B, C, Hs, Ws = x.shape
    Hp, Wp = ah_pad.shape[0], awt_pad.shape[1]
    return pl.pallas_call(
        _upsample_pad_kernel,
        out_shape=jax.ShapeDtypeStruct((B, C, Hp, Wp), jnp.float32),
        grid=(B,),
        in_specs=[
            pl.BlockSpec((None, C, Hs, Ws), lambda b: (b, 0, 0, 0)),
            pl.BlockSpec((Hp, Hs), lambda b: (0, 0)),
            pl.BlockSpec((Ws, Wp), lambda b: (0, 0)),
        ],
        out_specs=pl.BlockSpec((None, C, Hp, Wp), lambda b: (b, 0, 0, 0)),
        compiler_params=pltpu.CompilerParams(dimension_semantics=("parallel",)),
    )(x, ah_pad, awt_pad)


def conv1x1_upsample_pad(x, wt, bias, ah_pad, awt_pad):
    B, Cin, Hs, Ws = x.shape
    Cout = wt.shape[0]
    Hp, Wp = ah_pad.shape[0], awt_pad.shape[1]
    return pl.pallas_call(
        _conv1x1_upsample_pad_kernel,
        out_shape=jax.ShapeDtypeStruct((B, Cout, Hp, Wp), jnp.float32),
        grid=(B,),
        in_specs=[
            pl.BlockSpec((None, Cin, Hs, Ws), lambda b: (b, 0, 0, 0)),
            pl.BlockSpec((Hp, Hs), lambda b: (0, 0)),
            pl.BlockSpec((Ws, Wp), lambda b: (0, 0)),
            pl.BlockSpec(memory_space=pltpu.MemorySpace.SMEM),   # wt  (Cout, Cin)
            pl.BlockSpec(memory_space=pltpu.MemorySpace.SMEM),   # bias (Cout,)
        ],
        out_specs=pl.BlockSpec((None, Cout, Hp, Wp), lambda b: (b, 0, 0, 0)),
        compiler_params=pltpu.CompilerParams(dimension_semantics=("parallel",)),
    )(x, ah_pad, awt_pad, wt, bias)


def conv3x3_fused(feats, wf_hwio, bf, Hout, Wout):
    """Final 3x3 conv (padding already baked into inputs) with the concat fused in.

    feats: 5 padded branch feature maps, each (B, Cg, Hp, Wp) f32.
    An im2col matrix (9*Ctot, Hout*Wp) is built in a VMEM scratch from static lane
    slices of the flattened padded maps, then the conv is a single K = 9*Ctot bf16
    matmul with a lane-dense (Cout, Hout*Wp) f32 output.
    """
    B = feats[0].shape[0]
    Hp, Wp = feats[0].shape[2], feats[0].shape[3]
    L = Hout * Wp
    Cgs = [f.shape[1] for f in feats]
    Ctot = sum(Cgs)
    Cout = wf_hwio.shape[3]

    # (3,3,Ctot,Cout) -> (Cout, 9*Ctot), K ordered as (branch, dy, dx, c_in_branch)
    w_t = jnp.transpose(wf_hwio, (3, 0, 1, 2))                   # (Cout, 3, 3, Ctot)
    blocks, coff = [], 0
    for Cg in Cgs:
        blocks.append(w_t[:, :, :, coff:coff + Cg].reshape(Cout, 9 * Cg))
        coff += Cg
    w2 = jnp.concatenate(blocks, axis=1).astype(jnp.bfloat16)    # (Cout, 9*Ctot)
    b2 = bf.reshape(Cout, 1).astype(jnp.float32)

    flat = [f.reshape(B, c, Hp * Wp) for f, c in zip(feats, Cgs)]  # free bitcasts

    def kernel(w_ref, b_ref, f0, f1, f2, f3, f4, o_ref, col_ref):
        koff = 0
        for f in (f0, f1, f2, f3, f4):
            Cg = f.shape[0]
            for dy in range(3):
                for dx in range(3):
                    s = dy * Wp + dx              # static lane offset of this tap
                    col_ref[koff:koff + Cg, :] = f[:, s:s + L]
                    koff += Cg
        out = jnp.dot(w_ref[...], col_ref[...].astype(jnp.bfloat16),
                      preferred_element_type=jnp.float32)        # (Cout, L) f32
        o_ref[...] = out + b_ref[...]                            # bias add in f32

    out = pl.pallas_call(
        kernel,
        out_shape=jax.ShapeDtypeStruct((B, Cout, L), jnp.float32),
        grid=(B,),
        in_specs=[pl.BlockSpec((Cout, 9 * Ctot), lambda b: (0, 0)),
                  pl.BlockSpec((Cout, 1), lambda b: (0, 0))]
                 + [pl.BlockSpec((None, Cg, Hp * Wp), lambda b: (b, 0, 0))
                    for Cg in Cgs],
        out_specs=pl.BlockSpec((None, Cout, L), lambda b: (b, 0, 0)),
        scratch_shapes=[pltpu.VMEM((9 * Ctot, L), jnp.float32)],
        compiler_params=pltpu.CompilerParams(dimension_semantics=("parallel",)),
    )(w2, b2, *flat)

    # Each output row carries Wp = Wout+2 columns; the last 2 are im2col wrap garbage.
    return out.reshape(B, Cout, Hout, Wp)[:, :, :, :Wout]


def multi_scale_forward(x_nchw, params, output_size):
    """Pallas implementation of MultiScaleConvolutionModule.forward (NCHW in/out)."""
    Hout, Wout = output_size
    B, Cin, Hin, Win = x_nchw.shape

    feats = []
    # upsample(x): raw-input branch (identity 1x1 conv dropped per review)
    ah, awt = _padded_up_mats(Hout, Wout, Hin, Win)
    feats.append(upsample_pad(x_nchw, ah, awt))

    # pool_k -> 1x1 conv -> upsample branches
    for k, (wn, bn) in zip([1, 2, 3, 4], [("w1", "b1"), ("w2", "b2"),
                                          ("w3", "b3"), ("w4", "b4")]):
        xp = _maxpool(x_nchw, k)
        ah, awt = _padded_up_mats(Hout, Wout, xp.shape[2], xp.shape[3])
        feats.append(conv1x1_upsample_pad(xp, params[wn], params[bn], ah, awt))

    # cat(dim=1) + conv_final(3x3, padding=1), fused into one Pallas call
    return conv3x3_fused(feats, params["wf"], params["bf"], Hout, Wout)


# ------------------------------------------------------------ pure-JAX ref ---
def reference_forward(x, params, output_size):
    Hout, Wout = output_size

    def up(z):
        Ah = jnp.asarray(_interp_matrix(Hout, z.shape[2]))
        Aw = jnp.asarray(_interp_matrix(Wout, z.shape[3]))
        z = jnp.einsum("Hh,bchw->bcHw", Ah, z)
        return jnp.einsum("Ww,bchw->bchW", Aw, z)

    def c1(z, w, b):
        return jnp.einsum("oc,bchw->bohw", w, z) + b[None, :, None, None]

    feats = [up(x)]
    for k, (wn, bn) in zip([1, 2, 3, 4], [("w1", "b1"), ("w2", "b2"),
                                          ("w3", "b3"), ("w4", "b4")]):
        feats.append(up(c1(_maxpool(x, k), params[wn], params[bn])))
    cat = jnp.concatenate(feats, axis=1)
    y = lax.conv_general_dilated(cat, params["wf"], (1, 1), ((1, 1), (1, 1)),
                                 dimension_numbers=("NCHW", "HWIO", "NCHW"))
    return y + params["bf"][None, :, None, None]


# ---------------------------------------------------------------------- main -
if __name__ == "__main__":
    B, Cin, Cout = 2, 4, 4
    Hin = Win = 16
    output_size = (16, 16)
    Ctot = Cin + 4 * Cout

    key = jax.random.PRNGKey(0)
    ks = jax.random.split(key, 11)

    # 1x1 conv weights stored as (Cout, Cin)  (== torch (Cout,Cin,1,1) squeezed);
    # final 3x3 conv stored as HWIO (3,3,Ctot,Cout) (== torch (Cout,Ctot,3,3) permuted).
    params = {
        "w1": 0.1 * jax.random.normal(ks[0], (Cout, Cin), jnp.float32),
        "b1": 0.05 * jax.random.normal(ks[1], (Cout,), jnp.float32),
        "w2": 0.1 * jax.random.normal(ks[2], (Cout, Cin), jnp.float32),
        "b2": 0.05 * jax.random.normal(ks[3], (Cout,), jnp.float32),
        "w3": 0.1 * jax.random.normal(ks[4], (Cout, Cin), jnp.float32),
        "b3": 0.05 * jax.random.normal(ks[5], (Cout,), jnp.float32),
        "w4": 0.1 * jax.random.normal(ks[6], (Cout, Cin), jnp.float32),
        "b4": 0.05 * jax.random.normal(ks[7], (Cout,), jnp.float32),
        "wf": 0.1 * jax.random.normal(ks[8], (3, 3, Ctot, Cout), jnp.float32),
        "bf": 0.05 * jax.random.normal(ks[9], (Cout,), jnp.float32),
    }

    x = jax.random.normal(ks[10], (B, Cin, Hin, Win), jnp.float32)   # NCHW, like PyTorch

    out = jax.block_until_ready(multi_scale_forward(x, params, output_size))
    assert out.shape == (B, Cout, output_size[0], output_size[1]), out.shape

    ref = jax.block_until_ready(reference_forward(x, params, output_size))
    err = float(np.max(np.abs(np.asarray(out) - np.asarray(ref))))
    # bf16 MXU operands (f32 accumulation) -> slightly looser tolerance than pure f32.
    assert np.allclose(np.asarray(out), np.asarray(ref), rtol=3e-2, atol=3e-2), err

    print("KERNEL_OK")
</pallas_src>

<mosaic_0001>
module attributes {stable_mosaic.version = 11 : i64} {
  func.func @_upsample_pad_kernel(%arg0: i32, %arg1: memref<1x4x16x16xf32, #tpu.memory_space<vmem>>, %arg2: memref<19x16xbf16, #tpu.memory_space<vmem>>, %arg3: memref<16x18xbf16, #tpu.memory_space<vmem>>, %arg4: memref<1x4x19x18xf32, #tpu.memory_space<vmem>>) attributes {dimension_semantics = [#tpu.dimension_semantics<parallel>], iteration_bounds = array<i64: 2>, scalar_prefetch = 0 : i64, scratch_operands = 0 : i64, tpu.core_type = #tpu.core_type<tc>, window_params = [{transform_indices = @transform_0, window_bounds = array<i64: 1, 4, 16, 16>}, {pipeline_mode = #tpu.pipeline_mode<synchronous>, transform_indices = @transform_1, window_bounds = array<i64: 19, 16>}, {pipeline_mode = #tpu.pipeline_mode<synchronous>, transform_indices = @transform_2, window_bounds = array<i64: 16, 18>}, {transform_indices = @transform_3, window_bounds = array<i64: 1, 4, 19, 18>}]} {
    %c0 = arith.constant 0 : index
    %c0_0 = arith.constant 0 : index
    %0 = vector.load %arg2[%c0, %c0_0] : memref<19x16xbf16, #tpu.memory_space<vmem>>, vector<19x16xbf16>
    %c0_1 = arith.constant 0 : index
    %c0_2 = arith.constant 0 : index
    %1 = vector.load %arg3[%c0_1, %c0_2] : memref<16x18xbf16, #tpu.memory_space<vmem>>, vector<16x18xbf16>
    %c0_3 = arith.constant 0 : index
    %c0_4 = arith.constant 0 : index
    %c0_5 = arith.constant 0 : index
    %c0_6 = arith.constant 0 : index
    %2 = vector.load %arg1[%c0_3, %c0_4, %c0_5, %c0_6] : memref<1x4x16x16xf32, #tpu.memory_space<vmem>>, vector<1x1x16x16xf32>
    %3 = vector.shape_cast %2 : vector<1x1x16x16xf32> to vector<16x16xf32>
    %4 = arith.truncf %3 : vector<16x16xf32> to vector<16x16xbf16>
    %cst = arith.constant dense<0.000000e+00> : vector<19x16xf32>
    %5 = tpu.matmul %0, %4, %cst {dimension_numbers = #tpu.dot_dimension_numbers<[1], [0], [0], [1], [0, 0, 1, 1], [], []>} : vector<19x16xbf16>, vector<16x16xbf16>, vector<19x16xf32> -> vector<19x16xf32>
    %6 = arith.truncf %5 : vector<19x16xf32> to vector<19x16xbf16>
    %cst_7 = arith.constant dense<0.000000e+00> : vector<19x18xf32>
    %7 = tpu.matmul %6, %1, %cst_7 {dimension_numbers = #tpu.dot_dimension_numbers<[1], [0], [0], [1], [0, 0, 1, 1], [], []>} : vector<19x16xbf16>, vector<16x18xbf16>, vector<19x18xf32> -> vector<19x18xf32>
    %c0_8 = arith.constant 0 : index
    %c0_9 = arith.constant 0 : index
    %c0_10 = arith.constant 0 : index
    %c0_11 = arith.constant 0 : index
    %8 = vector.load %arg4[%c0_8, %c0_9, %c0_10, %c0_11] : memref<1x4x19x18xf32, #tpu.memory_space<vmem>>, vector<1x1x19x18xf32>
    %9 = vector.shape_cast %8 : vector<1x1x19x18xf32> to vector<19x18xf32>
    %10 = vector.shape_cast %7 : vector<19x18xf32> to vector<1x1x19x18xf32>
    tpu.vector_store %arg4[%c0_8, %c0_9, %c0_10, %c0_11], %10 {strides = array<i32>} : memref<1x4x19x18xf32, #tpu.memory_space<vmem>>, vector<1x1x19x18xf32>,
    %c0_12 = arith.constant 0 : index
    %c1 = arith.constant 1 : index
    %c0_13 = arith.constant 0 : index
    %c0_14 = arith.constant 0 : index
    %11 = vector.load %arg1[%c0_12, %c1, %c0_13, %c0_14] : memref<1x4x16x16xf32, #tpu.memory_space<vmem>>, vector<1x1x16x16xf32>
    %12 = vector.shape_cast %11 : vector<1x1x16x16xf32> to vector<16x16xf32>
    %13 = arith.truncf %12 : vector<16x16xf32> to vector<16x16xbf16>
    %cst_15 = arith.constant dense<0.000000e+00> : vector<19x16xf32>
    %14 = tpu.matmul %0, %13, %cst_15 {dimension_numbers = #tpu.dot_dimension_numbers<[1], [0], [0], [1], [0, 0, 1, 1], [], []>} : vector<19x16xbf16>, vector<16x16xbf16>, vector<19x16xf32> -> vector<19x16xf32>
    %15 = arith.truncf %14 : vector<19x16xf32> to vector<19x16xbf16>
    %cst_16 = arith.constant dense<0.000000e+00> : vector<19x18xf32>
    %16 = tpu.matmul %15, %1, %cst_16 {dimension_numbers = #tpu.dot_dimension_numbers<[1], [0], [0], [1], [0, 0, 1, 1], [], []>} : vector<19x16xbf16>, vector<16x18xbf16>, vector<19x18xf32> -> vector<19x18xf32>
    %c0_17 = arith.constant 0 : index
    %c1_18 = arith.constant 1 : index
    %c0_19 = arith.constant 0 : index
    %c0_20 = arith.constant 0 : index
    %17 = vector.load %arg4[%c0_17, %c1_18, %c0_19, %c0_20] : memref<1x4x19x18xf32, #tpu.memory_space<vmem>>, vector<1x1x19x18xf32>
    %18 = vector.shape_cast %17 : vector<1x1x19x18xf32> to vector<19x18xf32>
    %19 = vector.shape_cast %16 : vector<19x18xf32> to vector<1x1x19x18xf32>
    tpu.vector_store %arg4[%c0_17, %c1_18, %c0_19, %c0_20], %19 {strides = array<i32>} : memref<1x4x19x18xf32, #tpu.memory_space<vmem>>, vector<1x1x19x18xf32>,
    %c0_21 = arith.constant 0 : index
    %c2 = arith.constant 2 : index
    %c0_22 = arith.constant 0 : index
    %c0_23 = arith.constant 0 : index
    %20 = vector.load %arg1[%c0_21, %c2, %c0_22, %c0_23] : memref<1x4x16x16xf32, #tpu.memory_space<vmem>>, vector<1x1x16x16xf32>
    %21 = vector.shape_cast %20 : vector<1x1x16x16xf32> to vector<16x16xf32>
    %22 = arith.truncf %21 : vector<16x16xf32> to vector<16x16xbf16>
    %cst_24 = arith.constant dense<0.000000e+00> : vector<19x16xf32>
    %23 = tpu.matmul %0, %22, %cst_24 {dimension_numbers = #tpu.dot_dimension_numbers<[1], [0], [0], [1], [0, 0, 1, 1], [], []>} : vector<19x16xbf16>, vector<16x16xbf16>, vector<19x16xf32> -> vector<19x16xf32>
    %24 = arith.truncf %23 : vector<19x16xf32> to vector<19x16xbf16>
    %cst_25 = arith.constant dense<0.000000e+00> : vector<19x18xf32>
    %25 = tpu.matmul %24, %1, %cst_25 {dimension_numbers = #tpu.dot_dimension_numbers<[1], [0], [0], [1], [0, 0, 1, 1], [], []>} : vector<19x16xbf16>, vector<16x18xbf16>, vector<19x18xf32> -> vector<19x18xf32>
    %c0_26 = arith.constant 0 : index
    %c2_27 = arith.constant 2 : index
    %c0_28 = arith.constant 0 : index
    %c0_29 = arith.constant 0 : index
    %26 = vector.load %arg4[%c0_26, %c2_27, %c0_28, %c0_29] : memref<1x4x19x18xf32, #tpu.memory_space<vmem>>, vector<1x1x19x18xf32>
    %27 = vector.shape_cast %26 : vector<1x1x19x18xf32> to vector<19x18xf32>
    %28 = vector.shape_cast %25 : vector<19x18xf32> to vector<1x1x19x18xf32>
    tpu.vector_store %arg4[%c0_26, %c2_27, %c0_28, %c0_29], %28 {strides = array<i32>} : memref<1x4x19x18xf32, #tpu.memory_space<vmem>>, vector<1x1x19x18xf32>,
    %c0_30 = arith.constant 0 : index
    %c3 = arith.constant 3 : index
    %c0_31 = arith.constant 0 : index
    %c0_32 = arith.constant 0 : index
    %29 = vector.load %arg1[%c0_30, %c3, %c0_31, %c0_32] : memref<1x4x16x16xf32, #tpu.memory_space<vmem>>, vector<1x1x16x16xf32>
    %30 = vector.shape_cast %29 : vector<1x1x16x16xf32> to vector<16x16xf32>
    %31 = arith.truncf %30 : vector<16x16xf32> to vector<16x16xbf16>
    %cst_33 = arith.constant dense<0.000000e+00> : vector<19x16xf32>
    %32 = tpu.matmul %0, %31, %cst_33 {dimension_numbers = #tpu.dot_dimension_numbers<[1], [0], [0], [1], [0, 0, 1, 1], [], []>} : vector<19x16xbf16>, vector<16x16xbf16>, vector<19x16xf32> -> vector<19x16xf32>
    %33 = arith.truncf %32 : vector<19x16xf32> to vector<19x16xbf16>
    %cst_34 = arith.constant dense<0.000000e+00> : vector<19x18xf32>
    %34 = tpu.matmul %33, %1, %cst_34 {dimension_numbers = #tpu.dot_dimension_numbers<[1], [0], [0], [1], [0, 0, 1, 1], [], []>} : vector<19x16xbf16>, vector<16x18xbf16>, vector<19x18xf32> -> vector<19x18xf32>
    %c0_35 = arith.constant 0 : index
    %c3_36 = arith.constant 3 : index
    %c0_37 = arith.constant 0 : index
    %c0_38 = arith.constant 0 : index
    %35 = vector.load %arg4[%c0_35, %c3_36, %c0_37, %c0_38] : memref<1x4x19x18xf32, #tpu.memory_space<vmem>>, vector<1x1x19x18xf32>
    %36 = vector.shape_cast %35 : vector<1x1x19x18xf32> to vector<19x18xf32>
    %37 = vector.shape_cast %34 : vector<19x18xf32> to vector<1x1x19x18xf32>
    tpu.vector_store %arg4[%c0_35, %c3_36, %c0_37, %c0_38], %37 {strides = array<i32>} : memref<1x4x19x18xf32, #tpu.memory_space<vmem>>, vector<1x1x19x18xf32>,
    return
  }
  func.func @transform_0(%arg0: i32) -> (i32, i32, i32, i32) {
    %c0_i32 = arith.constant 0 : i32
    %c0_i32_0 = arith.constant 0 : i32
    %c0_i32_1 = arith.constant 0 : i32
    %c0_i32_2 = arith.constant 0 : i32
    return %arg0, %c0_i32, %c0_i32_0, %c0_i32_1 : i32, i32, i32, i32
  }
  func.func @transform_1(%arg0: i32) -> (i32, i32) {
    %c0_i32 = arith.constant 0 : i32
    %c0_i32_0 = arith.constant 0 : i32
    %c0_i32_1 = arith.constant 0 : i32
    return %c0_i32, %c0_i32_0 : i32, i32
  }
  func.func @transform_2(%arg0: i32) -> (i32, i32) {
    %c0_i32 = arith.constant 0 : i32
    %c0_i32_0 = arith.constant 0 : i32
    %c0_i32_1 = arith.constant 0 : i32
    return %c0_i32, %c0_i32_0 : i32, i32
  }
  func.func @transform_3(%arg0: i32) -> (i32, i32, i32, i32) {
    %c0_i32 = arith.constant 0 : i32
    %c0_i32_0 = arith.constant 0 : i32
    %c0_i32_1 = arith.constant 0 : i32
    %c0_i32_2 = arith.constant 0 : i32
    return %arg0, %c0_i32, %c0_i32_0, %c0_i32_1 : i32, i32, i32, i32
  }
}

</mosaic_0001>

<bundles_post_ra>
// kernel: tpu_custom_call.1
= control target key start
LH: loop header
LB: loop body
LE: loop exit
PB: predicated region body
PF: predicated region fallthrough
CT: control target
= control target key end

     0   :  { %8 = vsyncpa [#allocation3], 0  ;;  %s1130_s0 = inlined_call_operand.hbm [shape: f32[2,4,16,16], index: 0, kind: input, shape index: {}]   ;;  %s1131_s1 = inlined_call_operand.vmem [shape: bf16[19,16], index: 1, kind: input, shape index: {}]   ;;  %s1132_s2 = inlined_call_operand.vmem [shape: bf16[16,18], index: 2, kind: input, shape index: {}]   ;;  %s1133_s3 = inlined_call_operand.vmem [shape: f32[2,4,19,18], index: 3, kind: output, shape index: {}]  }
   0x1   :  { %10 = vsyncpa [#allocation3 + $0x1], 0  ;;  %s985_s12 = smov 0   ;;  %s987_s13 = smov 0  }
   0x2   :  { %s989_s14 = smov 0   ;;  %s991_s15 = smov 0  }
   0x3 LB: > { %s1004_s16 = sadd.s32 4294967295, %s960_s15   ;;  %s1007_s17 = sadd.s32 1, %s960_s15   ;;  %s960_s15 = sphi %s991_s15, %s1140_s15   ;;  %s956_s14 = sphi %s989_s14, %s1139_s14   ;;  %s952_s13 = sphi %s987_s13, %s1138_s13   ;;  %s948_s12 = sphi %s985_s12, %s1137_s12  }
   0x4   : > { %s20_s18 = ssub.s32 %s960_s15, %s1007_s17  ;;  %s23_s19 = sadd.s32 1, %s956_s14 }
   0x5   : > { %p21_p0 = scmp.eq.s32.totalorder %s20_s18, 0  ;;  %p30_p1 = scmp.ne.s32.totalorder %s956_s14, %s952_s13 }
   0x6   : > { %p31_p2 = scmp.eq.s32.totalorder %s960_s15, 0  ;;  %p36_p3 = scmp.ne.s32.totalorder %s952_s13, %s948_s12 }
   0x7   : > { %s1017_s20 = scalar_select %p21_p0, %s956_s14, %s23_s19  }
   0x8   : > { %p32_p4 = por %p31_p2, %p30_p1  ;;  %p37_p5 = scmp.eq.s32.totalorder %s1004_s16, 0 }
   0x9   : > { %p858_p6 = scmp.lt.s32.totalorder %s960_s15, 2  ;;  %s134_s22 = sand.u32 1, %s956_s14  }
   0xa   : > { %p1021_p7 = por %p37_p5, %p36_p3  ;;  %s736_s23 = sshll.u32 %s134_s22, 6 }
   0xb   : > { %s778_s24 = sshll.u32 %s960_s15, 10  ;;  %s138_s28 = scalar_lea.vmem [#allocation2], %s736_s23 }
   0xc   : > { %s1030_s27 = scalar_lea.hbm %s1130_s0, %s778_s24  ;;  %s145_s29 = sshll.u32 %s138_s28, 4  ;;  %s1032_s29 = int_to_ptr.vmem [resolvable:$true] %s145_s29 }
   0xd   : > { %p1034_p8 = pnand %p858_p6, %p32_p4  ;;  %s1039_s4 = scalar_lea.sflag [#allocation3], %s134_s22 }
   0xe   : > { %s896_s5 = scalar_lea.hbm %s1030_s27, 1024  ;;  %s901_s8 = scalar_lea.hbm %s1130_s0, 2048 }
   0xf   : > { %p897_p10 = scmp.ne.s32.totalorder %s1030_s27, %s896_s5  ;;  %p898_p11 = pneg %p1034_p8 }
  0x10   : > { %p902_p0 = scmp.lt.u32.totalorder %s1030_s27, %s1130_s0  ;;  %p903_p1 = scmp.lt.u32.totalorder %s901_s8, %s896_s5 }
  0x11   : > { %p899_p12 = pnand %p898_p11, %p897_p10  ;;  %p905_p3 = scmp.lt.u32.totalorder %s896_s5, %s1030_s27 }
  0x12   : > { %p904_p2 = por %p903_p1, %p902_p0 }
  0x13   : > { %p900_p13 = pneg %p899_p12 }
  0x14   : > { %p906_p4 = por %p905_p3, %p904_p2 }
  0x16   : > { %p907_p5 = pnand %p906_p4, %p900_p13 }
  0x18   : > { %910 = shalt.err (!%p907_p5)
}
  0x19   : > { %s911_s11 = scalar_lea.vmem %s1032_s29, 1024  ;;  %s962_s12 = smov [#allocation2]  }
  0x1a   : > { %p912_p6 = scmp.ne.s32.totalorder %s1032_s29, %s911_s11  ;;  %s916_s18 = sshll.u32 %s962_s12, 4  ;;  %s917_s18 = int_to_ptr.vmem [resolvable:$false] %s916_s18 }
  0x1b   : > { %s918_s19 = scalar_lea.vmem %s917_s18, 2048  ;;  %p919_p9 = scmp.lt.s32.totalorder %s1032_s29, %s917_s18 }
  0x1c   : > { %p914_p10 = pnand %p912_p6, %p898_p11  ;;  %p920_p0 = scmp.lt.s32.totalorder %s918_s19, %s911_s11 }
  0x1e   : > { %p915_p12 = pneg %p914_p10  ;;  %p921_p1 = por %p920_p0, %p919_p9 }
  0x20   : > { %p922_p2 = pnand %p921_p1, %p915_p12 }
  0x22   : > { %925 = shalt.err (!%p922_p2)
}
  0x23   : > { %s963_s22 = smov 128   ;;  %s964_s23 = smov 8  }
  0x24   : > { %857 = dma.hbm_to_vmem [thread:$0]  (!%p1034_p8), %s1030_s27, 1024, %s1032_s29, %s1039_s4, %s963_s22, %s963_s22, %s964_s23  }
  0x25   : > { %p153_p11 = scmp.lt.s32.totalorder %s960_s15, 3  ;;  %p1136_p13 = scmp.ge.s32.totalorder %s960_s15, 1 }
  0x27   : > { %p154_p3 = pnand %p1136_p13, %p153_p11 }
  0x28   : > { %s159_s24 = sand.u32 (!%p154_p3), 1, %s952_s13  }
  0x29   : > { %157 = sbr.rel (%p154_p3) target bundleno = 514 (0x202), region = 32  ;;  %s740_s25 = sshll.u32 (!%p154_p3), %s159_s24, 6 }
  0x2a   : > { %s160_s26 = scalar_lea.sflag (!%p154_p3), [#allocation3], %s159_s24  ;;  %s163_s28 = scalar_lea.vmem (!%p154_p3), [#allocation2], %s740_s25 }
  0x30   : > { %943 = dma.done.wait (%p1021_p7), %s160_s26, 1024  }
  0x31   : > { %945 = vsyncadd (%p1021_p7), %s160_s26, 4294966272  ;;  %v197_v0 = vld [vmem:[%s163_s28] sm:$0xff]  ;;  %v198_v1 = vld [vmem:[%s163_s28 + $0x8] sm:$0xff]  ;;  %vm208_vm0 = vcmask 130048   ;;  %p186_p7 = scmp.lt.s32.totalorder %s1004_s16, 1  ;;  %vm328_vm1 = vcmask 141312  }
  0x32   : > { %v199_v2 = vpack.c.bf16 %v198_v1, %v197_v0  ;;  %v893_v3 = vld [vmem:[%s1131_s1] sm:$0xff]   ;;  %v749_v4 = vld [vmem:[%s163_s28 + $0x10] sm:$0xff]  ;;  %v750_v5 = vld [vmem:[%s163_s28 + $0x18] sm:$0xff]  ;;  %vm325_vm2 = vcmask 146432  }
  0x33   : > { %805 = vmatprep.mubr.msk.bf16.mxu0 %vm208_vm0, %v893_v3  ;;  %v894_v6 = vld [vmem:[%s1131_s1 + $0x8] ss:$0 sps:$4 sm:$0x33]   ;;  %v333_v7 = vpack.c.bf16 %v750_v5, %v749_v4  ;;  %v758_v8 = vld [vmem:[%s163_s28 + $0x20] sm:$0xff]  ;;  %v767_v11 = vld [vmem:[%s163_s28 + $0x30] sm:$0xff]  ;;  %s1142_s16 = smov (!%p186_p7, %s1004_s16), 1 }
  0x34   : > { %803 = vmatprep.subr.bf16.mxu0 %v199_v2  ;;  %v759_v9 = vld [vmem:[%s163_s28 + $0x28] sm:$0xff]  ;;  %v768_v12 = vld [vmem:[%s163_s28 + $0x38] sm:$0xff]  ;;  %v895_v14 = vld [vmem:[%s1132_s2] sm:$0xff]   ;;  %s851_s5 = smul.u32 96, %s1142_s16 }
  0x35   : > { %804 = vmatpush3.bf16.msra.mxu0 %v199_v2  ;;  %v445_v10 = vpack.c.bf16 %v759_v9, %v758_v8  ;;  %v557_v13 = vpack.c.bf16 %v768_v12, %v767_v11  ;;  %809 = vmatprep.subr.bf16.mxu1 %v895_v14 }
  0x36   : > { %815 = vmatprep.subr.bf16.mxu0 %v333_v7  ;;  %810 = vmatpush3.bf16.msra.mxu1 %v895_v14  ;;  %s190_s8 = scalar_lea.vmem %s1133_s3, %s851_s5 }
  0x37   : > { %821 = vmatprep.subr.bf16.mxu1 %v895_v14 }
  0x38   : > { %806 = vmatmul.mubr.msk.bf16.vlgmr.msra.gmra.mrb[0].mxu0 %vm208_vm0, %v894_v6 }
  0x39   : > { %816 = vmatpush3.bf16.msra.mxu0 %v333_v7  ;;  %817 = vmatprep.mubr.msk.bf16.mxu0 %vm208_vm0, %v893_v3 }
  0x3a   : > { %827 = vmatprep.subr.bf16.mxu0 %v445_v10 }
  0x40   : > { %818 = vmatmul.mubr.msk.bf16.vlgmr.msra.gmra.mrb[4].mxu0 %vm208_vm0, %v894_v6 }
  0x41   : > { %828 = vmatpush3.bf16.msra.mxu0 %v445_v10  ;;  %829 = vmatprep.mubr.msk.bf16.mxu0 %vm208_vm0, %v893_v3 }
  0x42   : > { %839 = vmatprep.subr.bf16.mxu0 %v557_v13 }
  0x48   : > { %830 = vmatmul.mubr.msk.bf16.vlgmr.msra.gmra.mrb[8].mxu0 %vm208_vm0, %v894_v6 }
  0x49   : > { %840 = vmatpush3.bf16.msra.mxu0 %v557_v13  ;;  %841 = vmatprep.mubr.msk.bf16.mxu0 %vm208_vm0, %v893_v3 }
  0x50   : > { %842 = vmatmul.mubr.msk.bf16.vlgmr.msra.gmra.mrb[12].mxu0 %vm208_vm0, %v894_v6 }
 0x10b   : > { %v807_v15 = vpop.f32.mrb[0].mxu0 }
 0x10c   : > { %v249_v16 = vpop.f32.mrb[1].mxu0  ;;  %v264_v20 = vpack.c.bf16 %v807_v15, %v807_v15 }
 0x10d   : > { %v808_v17 = vpop.f32.mrb[2].mxu0 }
 0x10e   : > { %v252_v18 = vpop.f32.mrb[3].mxu0 }
 0x10f   : > { %v263_v19 = vpack.c.bf16 %v252_v18, %v249_v16 }
 0x111   : > { %811 = vmatprep.mubr.msk.bf16.mxu1 %vm208_vm0, %v263_v19 }
 0x112   : > { %812 = vmatmul.mubr.msk.bf16.vlgmr.msra.gmra.mrb[0].mxu1 %vm208_vm0, %v264_v20 }
 0x113   : > { %v819_v21 = vpop.f32.mrb[4].mxu0  ;;  %822 = vmatpush3.bf16.msra.mxu1 %v895_v14 }
 0x114   : > { %v368_v22 = vpop.f32.mrb[5].mxu0  ;;  %833 = vmatprep.subr.bf16.mxu1 %v895_v14  ;;  %v383_v26 = vpack.c.bf16 %v819_v21, %v819_v21 }
 0x115   : > { %v820_v23 = vpop.f32.mrb[6].mxu0 }
 0x116   : > { %v371_v24 = vpop.f32.mrb[7].mxu0 }
 0x117   : > { %v382_v25 = vpack.c.bf16 %v371_v24, %v368_v22 }
 0x119   : > { %823 = vmatprep.mubr.msk.bf16.mxu1 %vm208_vm0, %v382_v25 }
 0x11a   : > { %824 = vmatmul.mubr.msk.bf16.vlgmr.msra.gmra.mrb[4].mxu1 %vm208_vm0, %v383_v26 }
 0x11b   : > { %v831_v27 = vpop.f32.mrb[8].mxu0  ;;  %834 = vmatpush3.bf16.msra.mxu1 %v895_v14 }
 0x11c   : > { %v480_v28 = vpop.f32.mrb[9].mxu0  ;;  %845 = vmatprep.subr.bf16.mxu1 %v895_v14  ;;  %v495_v32 = vpack.c.bf16 %v831_v27, %v831_v27 }
 0x11d   : > { %v832_v29 = vpop.f32.mrb[10].mxu0 }
 0x11e   : > { %v483_v30 = vpop.f32.mrb[11].mxu0 }
 0x11f   : > { %v494_v31 = vpack.c.bf16 %v483_v30, %v480_v28 }
 0x121   : > { %835 = vmatprep.mubr.msk.bf16.mxu1 %vm208_vm0, %v494_v31 }
 0x122   : > { %836 = vmatmul.mubr.msk.bf16.vlgmr.msra.gmra.mrb[8].mxu1 %vm208_vm0, %v495_v32 }
 0x123   : > { %v843_v33 = vpop.f32.mrb[12].mxu0  ;;  %846 = vmatpush3.bf16.msra.mxu1 %v895_v14 }
 0x124   : > { %v592_v34 = vpop.f32.mrb[13].mxu0  ;;  %v607_v38 = vpack.c.bf16 %v843_v33, %v843_v33 }
 0x125   : > { %v844_v35 = vpop.f32.mrb[14].mxu0 }
 0x126   : > { %v595_v36 = vpop.f32.mrb[15].mxu0 }
 0x127   : > { %v606_v37 = vpack.c.bf16 %v595_v36, %v592_v34 }
 0x129   : > { %847 = vmatprep.mubr.msk.bf16.mxu1 %vm208_vm0, %v606_v37 }
 0x12a   : > { %848 = vmatmul.mubr.msk.bf16.vlgmr.msra.gmra.mrb[12].mxu1 %vm208_vm0, %v607_v38 }
 0x1e5   : > { %v813_v39 = vpop.f32.mrb[0].mxu1 }
 0x1e6   : > { %329 = vst.msk [vmem:[%s190_s8 + $0x10] sm:$0x7] %vm328_vm1, %v813_v39  ;;  %v311_v40 = vpop.f32.mrb[1].mxu1 }
 0x1e7   : > { %326 = vst.msk [vmem:[%s190_s8] sm:$0xff] %vm325_vm2, %v311_v40  ;;  %v814_v41 = vpop.f32.mrb[2].mxu1 }
 0x1e8   : > { %v314_v42 = vpop.f32.mrb[3].mxu1 }
 0x1e9   : > { %327 = vst.msk [vmem:[%s190_s8 + $0x8] sm:$0xff] %vm325_vm2, %v314_v42 }
 0x1ed   : > { %v825_v43 = vpop.f32.mrb[4].mxu1 }
 0x1ee   : > { %757 = vst.msk [vmem:[%s190_s8 + $0x28] sm:$0x7] %vm328_vm1, %v825_v43  ;;  %v424_v44 = vpop.f32.mrb[5].mxu1 }
 0x1ef   : > { %755 = vst.msk [vmem:[%s190_s8 + $0x18] sm:$0xff] %vm325_vm2, %v424_v44  ;;  %v826_v45 = vpop.f32.mrb[6].mxu1 }
 0x1f0   : > { %v427_v46 = vpop.f32.mrb[7].mxu1 }
 0x1f1   : > { %756 = vst.msk [vmem:[%s190_s8 + $0x20] sm:$0xff] %vm325_vm2, %v427_v46 }
 0x1f5   : > { %v837_v47 = vpop.f32.mrb[8].mxu1 }
 0x1f6   : > { %766 = vst.msk [vmem:[%s190_s8 + $0x40] sm:$0x7] %vm328_vm1, %v837_v47  ;;  %v536_v48 = vpop.f32.mrb[9].mxu1 }
 0x1f7   : > { %764 = vst.msk [vmem:[%s190_s8 + $0x30] sm:$0xff] %vm325_vm2, %v536_v48  ;;  %v838_v49 = vpop.f32.mrb[10].mxu1 }
 0x1f8   : > { %v539_v50 = vpop.f32.mrb[11].mxu1 }
 0x1f9   : > { %765 = vst.msk [vmem:[%s190_s8 + $0x38] sm:$0xff] %vm325_vm2, %v539_v50 }
 0x1fd   : > { %v849_v51 = vpop.f32.mrb[12].mxu1 }
 0x1fe   : > { %775 = vst.msk [vmem:[%s190_s8 + $0x58] sm:$0x7] %vm328_vm1, %v849_v51  ;;  %v648_v52 = vpop.f32.mrb[13].mxu1 }
 0x1ff   : > { %773 = vst.msk [vmem:[%s190_s8 + $0x48] sm:$0xff] %vm325_vm2, %v648_v52  ;;  %v850_v53 = vpop.f32.mrb[14].mxu1 }
 0x200   : > { %v651_v54 = vpop.f32.mrb[15].mxu1 }
 0x201   : > { %774 = vst.msk [vmem:[%s190_s8 + $0x50] sm:$0xff] %vm325_vm2, %v651_v54 }
 0x202 PF: > { %p13_p8 = scmp.ge.s32.totalorder %s1007_s17, 4   ;;  %s1137_s12 = smov %s952_s13 }
 0x203   : > { %s1138_s13 = smov %s956_s14  ;;  %s1139_s14 = smov %s1017_s20 }
 0x204   : > { %s1140_s15 = smov %s1007_s17  ;;  %15 = sbr.rel (!%p13_p8) target bundleno = 3 (0x3), region = 78 }
 0x20b   :  { %687 = vsyncpa [#allocation3], 1 }
 0x20c   :  { %689 = vsyncpa [#allocation3 + $0x1], 1 }

</bundles_post_ra>
